<compile_context>
chip_gen: v7x
topology: tpu7x:2x2x1
jax: 0.10.0
libtpu: 0.0.40
codegen_flags: <defaults>
</compile_context>

<pallas_src>
import functools

import jax
import jax.numpy as jnp
from jax.experimental import pallas as pl
from jax.experimental.pallas import tpu as pltpu

# ---- BernoulliNetwork structural constants (defaults of the torch module) ----
N_AGENTS = 3
STATE_SIZE = 1 + 2 * N_AGENTS          # 7
ACTION_SIZE = N_AGENTS * 4             # 12
IN_DIM = STATE_SIZE + ACTION_SIZE      # 19  (forward reshapes to (-1, 19))
HIDDEN = 500                           # hidden_size default
OUT_DIM = 4                            # output_size default
OUT_PAD = 128                          # lane-dense padded output width
MAX_BATCH_TILE = 256                   # rows per grid step (batch tile)

_F32 = jnp.float32
_BF16 = jnp.bfloat16


def _round_up(n, m):
    return ((n + m - 1) // m) * m


# -----------------------------------------------------------------------------
# Fused kernel: Linear -> ReLU -> Linear -> ReLU -> Linear -> Sigmoid
# -----------------------------------------------------------------------------
def _bernoulli_mlp_kernel(x_ref, w1_ref, b1_ref, w2_ref, b2_ref, w3_ref, b3_ref,
                          o_ref):
    x = x_ref[...].astype(_BF16)
    h = jnp.dot(x, w1_ref[...], preferred_element_type=jnp.float32) + b1_ref[...]
    h = jnp.maximum(h, 0.0).astype(_BF16)
    h = jnp.dot(h, w2_ref[...], preferred_element_type=jnp.float32) + b2_ref[...]
    h = jnp.maximum(h, 0.0).astype(_BF16)
    z = jnp.dot(h, w3_ref[...], preferred_element_type=jnp.float32) + b3_ref[...]
    # sigmoid(z) = 1 / (1 + exp(-z)); exp + approx reciprocal both go to the EUP
    # slot, keeping the VALU free. Padded lanes (bias 0, weight 0) give 0.5 and
    # are discarded by the wrapper slice.
    o_ref[...] = pl.reciprocal(1.0 + jnp.exp(-z), approx=True)


# -----------------------------------------------------------------------------
# Wrapper
# -----------------------------------------------------------------------------
def bernoulli_network_forward(x, packed_params):
    """Forward pass. Returns the (B, 4) Bernoulli probabilities."""
    w1, b1, w2, b2, w3, b3 = packed_params
    x = x.reshape(-1, IN_DIM).astype(_F32)
    batch = x.shape[0]

    tile_b = min(MAX_BATCH_TILE, _round_up(batch, 8))
    b_pad = _round_up(batch, tile_b)
    if b_pad != batch:
        x = jnp.pad(x, ((0, b_pad - batch), (0, 0)))
    grid = (b_pad // tile_b,)

    # batch-tiled activations; full-array resident weights (constant index_map)
    def _resident(shape):
        return pl.BlockSpec(shape, lambda i: (0, 0))

    cost = pl.CostEstimate(
        flops=2 * b_pad * (IN_DIM * HIDDEN + HIDDEN * HIDDEN + HIDDEN * OUT_PAD),
        transcendentals=b_pad * OUT_PAD,
        bytes_accessed=(x.size * 4
                        + (w1.size + w2.size + w3.size) * 2
                        + (b1.size + b2.size + b3.size) * 4
                        + b_pad * OUT_PAD * 4),
    )

    out = pl.pallas_call(
        _bernoulli_mlp_kernel,
        out_shape=jax.ShapeDtypeStruct((b_pad, OUT_PAD), _F32),
        grid=grid,
        in_specs=[
            pl.BlockSpec((tile_b, IN_DIM), lambda i: (i, 0)),
            _resident(w1.shape), _resident(b1.shape),
            _resident(w2.shape), _resident(b2.shape),
            _resident(w3.shape), _resident(b3.shape),
        ],
        out_specs=pl.BlockSpec((tile_b, OUT_PAD), lambda i: (i, 0)),
        compiler_params=pltpu.CompilerParams(
            dimension_semantics=("parallel",)),
        cost_estimate=cost,
    )(x, w1, b1, w2, b2, w3, b3)

    # drop padded batch rows and padded output lanes
    return out[:batch, :OUT_DIM]


# -----------------------------------------------------------------------------
# Deterministic parameter init (PyTorch-Linear-style uniform init) + packing
# -----------------------------------------------------------------------------
def _init_linear(key, fan_in, fan_out):
    kw, kb = jax.random.split(key)
    bound = 1.0 / jnp.sqrt(jnp.array(fan_in, _F32))
    w = jax.random.uniform(kw, (fan_in, fan_out), _F32, -bound, bound)
    b = jax.random.uniform(kb, (1, fan_out), _F32, -bound, bound)
    return w, b


def init_params(key):
    ks = jax.random.split(key, 3)
    w1, b1 = _init_linear(ks[0], IN_DIM, HIDDEN)
    w2, b2 = _init_linear(ks[1], HIDDEN, HIDDEN)
    w3, b3 = _init_linear(ks[2], HIDDEN, OUT_DIM)
    return (w1, b1, w2, b2, w3, b3)


def pack_params(params_f32):
    """Cast weights to bf16 and lane-pad the last layer to 128 outputs."""
    w1, b1, w2, b2, w3, b3 = params_f32
    w3p = jnp.pad(w3, ((0, 0), (0, OUT_PAD - OUT_DIM)))
    b3p = jnp.pad(b3, ((0, 0), (0, OUT_PAD - OUT_DIM)))
    return (w1.astype(_BF16), b1,
            w2.astype(_BF16), b2,
            w3p.astype(_BF16), b3p)


# -----------------------------------------------------------------------------
# Pure-JAX f32 reference (mirrors the torch module exactly)
# -----------------------------------------------------------------------------
def reference_forward(x, params_f32):
    w1, b1, w2, b2, w3, b3 = params_f32
    x = x.reshape(-1, IN_DIM)
    h = jax.nn.relu(x @ w1 + b1)
    h = jax.nn.relu(h @ w2 + b2)
    return jax.nn.sigmoid(h @ w3 + b3)


# -----------------------------------------------------------------------------
if __name__ == "__main__":
    key = jax.random.PRNGKey(0)
    kx, kp = jax.random.split(key)

    params = init_params(kp)
    packed = pack_params(params)

    # x is reshaped to (-1, 19) inside forward, exactly like the torch module
    x = jax.random.normal(kx, (2, 4, IN_DIM), _F32)

    probs = jax.block_until_ready(
        jax.jit(bernoulli_network_forward)(x, packed))

    assert probs.shape == (8, OUT_DIM)
    # Bernoulli parameters must be valid probabilities
    assert bool(jnp.all(probs >= 0.0)) and bool(jnp.all(probs <= 1.0))
    # match the f32 reference (bf16 weights + approx reciprocal => loose tol)
    ref = reference_forward(x, params)
    assert jnp.allclose(probs, ref, atol=2e-2), float(jnp.max(jnp.abs(probs - ref)))

    # TODO(synk): torch wraps these probabilities in a Bernoulli distribution
    # object; sampling/log_prob is left to the caller.
    print("KERNEL_OK")
</pallas_src>

<mosaic_0001>
module attributes {stable_mosaic.version = 11 : i64} {
  func.func @_bernoulli_mlp_kernel(%arg0: i32, %arg1: memref<8x19xf32, #tpu.memory_space<vmem>>, %arg2: memref<19x500xbf16, #tpu.memory_space<vmem>>, %arg3: memref<1x500xf32, #tpu.memory_space<vmem>>, %arg4: memref<500x500xbf16, #tpu.memory_space<vmem>>, %arg5: memref<1x500xf32, #tpu.memory_space<vmem>>, %arg6: memref<500x128xbf16, #tpu.memory_space<vmem>>, %arg7: memref<1x128xf32, #tpu.memory_space<vmem>>, %arg8: memref<8x128xf32, #tpu.memory_space<vmem>>) attributes {dimension_semantics = [#tpu.dimension_semantics<parallel>], iteration_bounds = array<i64: 1>, scalar_prefetch = 0 : i64, scratch_operands = 0 : i64, tpu.core_type = #tpu.core_type<tc>, window_params = [{transform_indices = @transform_0, window_bounds = array<i64: 8, 19>}, {pipeline_mode = #tpu.pipeline_mode<synchronous>, transform_indices = @transform_1, window_bounds = array<i64: 19, 500>}, {pipeline_mode = #tpu.pipeline_mode<synchronous>, transform_indices = @transform_2, window_bounds = array<i64: 1, 500>}, {pipeline_mode = #tpu.pipeline_mode<synchronous>, transform_indices = @transform_3, window_bounds = array<i64: 500, 500>}, {pipeline_mode = #tpu.pipeline_mode<synchronous>, transform_indices = @transform_4, window_bounds = array<i64: 1, 500>}, {pipeline_mode = #tpu.pipeline_mode<synchronous>, transform_indices = @transform_5, window_bounds = array<i64: 500, 128>}, {pipeline_mode = #tpu.pipeline_mode<synchronous>, transform_indices = @transform_6, window_bounds = array<i64: 1, 128>}, {transform_indices = @transform_7, window_bounds = array<i64: 8, 128>}]} {
    %c0 = arith.constant 0 : index
    %c0_0 = arith.constant 0 : index
    %0 = vector.load %arg1[%c0, %c0_0] : memref<8x19xf32, #tpu.memory_space<vmem>>, vector<8x19xf32>
    %1 = arith.truncf %0 : vector<8x19xf32> to vector<8x19xbf16>
    %c0_1 = arith.constant 0 : index
    %c0_2 = arith.constant 0 : index
    %2 = vector.load %arg2[%c0_1, %c0_2] : memref<19x500xbf16, #tpu.memory_space<vmem>>, vector<19x500xbf16>
    %cst = arith.constant dense<0.000000e+00> : vector<8x500xf32>
    %3 = tpu.matmul %1, %2, %cst {dimension_numbers = #tpu.dot_dimension_numbers<[1], [0], [0], [1], [0, 0, 1, 1], [], []>} : vector<8x19xbf16>, vector<19x500xbf16>, vector<8x500xf32> -> vector<8x500xf32>
    %c0_3 = arith.constant 0 : index
    %c0_4 = arith.constant 0 : index
    %4 = vector.load %arg3[%c0_3, %c0_4] : memref<1x500xf32, #tpu.memory_space<vmem>>, vector<1x500xf32>
    %5 = vector.broadcast %4 : vector<1x500xf32> to vector<8x500xf32>
    %6 = arith.addf %3, %5 : vector<8x500xf32>
    %cst_5 = arith.constant 0.000000e+00 : f32
    %7 = vector.broadcast %cst_5 : f32 to vector<8x500xf32>
    %8 = arith.maximumf %6, %7 : vector<8x500xf32>
    %9 = arith.truncf %8 : vector<8x500xf32> to vector<8x500xbf16>
    %c0_6 = arith.constant 0 : index
    %c0_7 = arith.constant 0 : index
    %10 = vector.load %arg4[%c0_6, %c0_7] : memref<500x500xbf16, #tpu.memory_space<vmem>>, vector<500x500xbf16>
    %cst_8 = arith.constant dense<0.000000e+00> : vector<8x500xf32>
    %11 = tpu.matmul %9, %10, %cst_8 {dimension_numbers = #tpu.dot_dimension_numbers<[1], [0], [0], [1], [0, 0, 1, 1], [], []>} : vector<8x500xbf16>, vector<500x500xbf16>, vector<8x500xf32> -> vector<8x500xf32>
    %c0_9 = arith.constant 0 : index
    %c0_10 = arith.constant 0 : index
    %12 = vector.load %arg5[%c0_9, %c0_10] : memref<1x500xf32, #tpu.memory_space<vmem>>, vector<1x500xf32>
    %13 = vector.broadcast %12 : vector<1x500xf32> to vector<8x500xf32>
    %14 = arith.addf %11, %13 : vector<8x500xf32>
    %cst_11 = arith.constant 0.000000e+00 : f32
    %15 = vector.broadcast %cst_11 : f32 to vector<8x500xf32>
    %16 = arith.maximumf %14, %15 : vector<8x500xf32>
    %17 = arith.truncf %16 : vector<8x500xf32> to vector<8x500xbf16>
    %c0_12 = arith.constant 0 : index
    %c0_13 = arith.constant 0 : index
    %18 = vector.load %arg6[%c0_12, %c0_13] : memref<500x128xbf16, #tpu.memory_space<vmem>>, vector<500x128xbf16>
    %cst_14 = arith.constant dense<0.000000e+00> : vector<8x128xf32>
    %19 = tpu.matmul %17, %18, %cst_14 {dimension_numbers = #tpu.dot_dimension_numbers<[1], [0], [0], [1], [0, 0, 1, 1], [], []>} : vector<8x500xbf16>, vector<500x128xbf16>, vector<8x128xf32> -> vector<8x128xf32>
    %c0_15 = arith.constant 0 : index
    %c0_16 = arith.constant 0 : index
    %20 = vector.load %arg7[%c0_15, %c0_16] : memref<1x128xf32, #tpu.memory_space<vmem>>, vector<1x128xf32>
    %21 = vector.broadcast %20 : vector<1x128xf32> to vector<8x128xf32>
    %22 = arith.addf %19, %21 : vector<8x128xf32>
    %cst_17 = arith.constant 0.000000e+00 : f32
    %23 = vector.broadcast %cst_17 : f32 to vector<8x128xf32>
    %24 = arith.subf %23, %22 : vector<8x128xf32>
    %25 = math.exp %24 : vector<8x128xf32>
    %cst_18 = arith.constant 1.000000e+00 : f32
    %26 = vector.broadcast %cst_18 : f32 to vector<8x128xf32>
    %27 = arith.addf %26, %25 : vector<8x128xf32>
    %28 = tpu.reciprocal %27 {approx = true} : vector<8x128xf32> -> vector<8x128xf32>
    %c0_19 = arith.constant 0 : index
    %c0_20 = arith.constant 0 : index
    %29 = vector.load %arg8[%c0_19, %c0_20] : memref<8x128xf32, #tpu.memory_space<vmem>>, vector<8x128xf32>
    tpu.vector_store %arg8[%c0_19, %c0_20], %28 {strides = array<i32>} : memref<8x128xf32, #tpu.memory_space<vmem>>, vector<8x128xf32>,
    return
  }
  func.func @transform_0(%arg0: i32) -> (i32, i32) {
    %c0_i32 = arith.constant 0 : i32
    %c0_i32_0 = arith.constant 0 : i32
    return %arg0, %c0_i32 : i32, i32
  }
  func.func @transform_1(%arg0: i32) -> (i32, i32) {
    %c0_i32 = arith.constant 0 : i32
    %c0_i32_0 = arith.constant 0 : i32
    %c0_i32_1 = arith.constant 0 : i32
    return %c0_i32, %c0_i32_0 : i32, i32
  }
  func.func @transform_2(%arg0: i32) -> (i32, i32) {
    %c0_i32 = arith.constant 0 : i32
    %c0_i32_0 = arith.constant 0 : i32
    %c0_i32_1 = arith.constant 0 : i32
    return %c0_i32, %c0_i32_0 : i32, i32
  }
  func.func @transform_3(%arg0: i32) -> (i32, i32) {
    %c0_i32 = arith.constant 0 : i32
    %c0_i32_0 = arith.constant 0 : i32
    %c0_i32_1 = arith.constant 0 : i32
    return %c0_i32, %c0_i32_0 : i32, i32
  }
  func.func @transform_4(%arg0: i32) -> (i32, i32) {
    %c0_i32 = arith.constant 0 : i32
    %c0_i32_0 = arith.constant 0 : i32
    %c0_i32_1 = arith.constant 0 : i32
    return %c0_i32, %c0_i32_0 : i32, i32
  }
  func.func @transform_5(%arg0: i32) -> (i32, i32) {
    %c0_i32 = arith.constant 0 : i32
    %c0_i32_0 = arith.constant 0 : i32
    %c0_i32_1 = arith.constant 0 : i32
    return %c0_i32, %c0_i32_0 : i32, i32
  }
  func.func @transform_6(%arg0: i32) -> (i32, i32) {
    %c0_i32 = arith.constant 0 : i32
    %c0_i32_0 = arith.constant 0 : i32
    %c0_i32_1 = arith.constant 0 : i32
    return %c0_i32, %c0_i32_0 : i32, i32
  }
  func.func @transform_7(%arg0: i32) -> (i32, i32) {
    %c0_i32 = arith.constant 0 : i32
    %c0_i32_0 = arith.constant 0 : i32
    return %arg0, %c0_i32 : i32, i32
  }
}

</mosaic_0001>

<bundles_post_ra>
// kernel: bernoulli_network_forward.1
= control target key start
LH: loop header
LB: loop body
LE: loop exit
PB: predicated region body
PF: predicated region fallthrough
CT: control target
= control target key end

     0   :  { %12 = vsyncpa [#allocation3], 0  ;;  %s2303_s0 = inlined_call_operand.hbm [shape: f32[8,19], index: 0, kind: input, shape index: {}]   ;;  %s2304_s1 = inlined_call_operand.hbm [shape: bf16[19,500], index: 1, kind: input, shape index: {}]   ;;  %s2305_s2 = inlined_call_operand.vmem [shape: f32[1,500], index: 2, kind: input, shape index: {}]   ;;  %s2306_s3 = inlined_call_operand.hbm [shape: bf16[500,500], index: 3, kind: input, shape index: {}]   ;;  %s2307_s4 = inlined_call_operand.vmem [shape: f32[1,500], index: 4, kind: input, shape index: {}]   ;;  %s2308_s5 = inlined_call_operand.hbm [shape: bf16[500,128], index: 5, kind: input, shape index: {}]   ;;  %s2309_s6 = inlined_call_operand.vmem [shape: f32[1,128], index: 6, kind: input, shape index: {}]   ;;  %s2310_s7 = inlined_call_operand.vmem [shape: f32[8,128], index: 7, kind: output, shape index: {}]  }
   0x1   :  { %13 = vsyncpa [#allocation5], 0 }
   0x2   :  { %14 = vsyncpa [#allocation8], 0  ;;  %s2147_s24 = smov [#allocation4]   ;;  %s2053_s28 = scalar_lea.hbm %s2304_s1, 768 }
   0x3   :  { %s30_s25 = sshll.u32 %s2147_s24, 4  ;;  %p2054_p0 = scmp.ne.s32.totalorder %s2304_s1, %s2053_s28  ;;  %s31_s25 = int_to_ptr.vmem [resolvable:$true] %s30_s25 }
   0x4   :  { %p2057_p1 = scmp.lt.u32.totalorder %s2053_s28, %s2304_s1 }
   0x6   :  { %p2059_p2 = pnand %p2057_p1, %p2054_p0 }
   0x8   :  { %2062 = shalt.err (!%p2059_p2)
}
   0x9   :  { %s2063_s10 = scalar_lea.vmem %s31_s25, 768  ;;  %p2068_p4 = scmp.lt.s32.totalorder %s31_s25, %s31_s25 }
   0xa   :  { %p2064_p3 = scmp.ne.s32.totalorder %s31_s25, %s2063_s10  ;;  %p2069_p5 = scmp.lt.s32.totalorder %s2063_s10, %s2063_s10 }
   0xc   :  { %p2070_p6 = por %p2069_p5, %p2068_p4 }
   0xe   :  { %p2071_p7 = pnand %p2070_p6, %p2064_p3 }
  0x10   :  { %2074 = shalt.err (!%p2071_p7)
}
  0x11   :  { %s2148_s11 = smov 256   ;;  %s2149_s12 = smov 16  }
  0x12   :  { %36 = dma.hbm_to_vmem [thread:$0]  %s2304_s1, 768, %s31_s25, [#allocation5], %s2148_s11, %s2148_s11, %s2149_s12  }
  0x13   :  { %s2150_s15 = smov [#allocation2]   ;;  %s2151_s17 = smov [#allocation6]  }
  0x14   :  { %s21_s16 = sshll.u32 %s2150_s15, 4  ;;  %s44_s18 = sshll.u32 %s2151_s17, 4  ;;  %s22_s16 = int_to_ptr.vmem [resolvable:$true] %s21_s16  ;;  %s45_s18 = int_to_ptr.vmem [resolvable:$true] %s44_s18 }
  0x15   :  { %s2075_s21 = scalar_lea.hbm %s2303_s0, 128 }
  0x16   :  { %p2076_p8 = scmp.ne.s32.totalorder %s2303_s0, %s2075_s21  ;;  %p2079_p9 = scmp.lt.u32.totalorder %s2075_s21, %s2303_s0 }
  0x18   :  { %p2081_p10 = pnand %p2079_p9, %p2076_p8 }
  0x1a   :  { %2084 = shalt.err (!%p2081_p10)
}
  0x1b   :  { %s2085_s1 = scalar_lea.vmem %s22_s16, 128  ;;  %p2090_p12 = scmp.lt.s32.totalorder %s22_s16, %s22_s16 }
  0x1c   :  { %p2086_p11 = scmp.ne.s32.totalorder %s22_s16, %s2085_s1  ;;  %p2091_p13 = scmp.lt.s32.totalorder %s2085_s1, %s2085_s1 }
  0x1e   :  { %p2092_p0 = por %p2091_p13, %p2090_p12 }
  0x20   :  { %p2093_p1 = pnand %p2092_p0, %p2086_p11 }
  0x22   :  { %2096 = shalt.err (!%p2093_p1)
}
  0x23   :  { %24 = dma.hbm_to_vmem [thread:$0]  %s2303_s0, 128, %s22_s16, [#allocation3]  }
  0x24   :  { %s2097_s30 = scalar_lea.hbm %s2306_s3, 16128 }
  0x25   :  { %p2098_p2 = scmp.ne.s32.totalorder %s2306_s3, %s2097_s30  ;;  %p2101_p3 = scmp.lt.u32.totalorder %s2097_s30, %s2306_s3 }
  0x27   :  { %p2103_p4 = pnand %p2101_p3, %p2098_p2 }
  0x29   :  { %2106 = shalt.err (!%p2103_p4)
}
  0x2a   :  { %s2107_s14 = scalar_lea.vmem %s45_s18, 16128  ;;  %p2112_p6 = scmp.lt.s32.totalorder %s45_s18, %s45_s18 }
  0x2b   :  { %p2108_p5 = scmp.ne.s32.totalorder %s45_s18, %s2107_s14  ;;  %p2113_p7 = scmp.lt.s32.totalorder %s2107_s14, %s2107_s14 }
  0x2d   :  { %p2114_p8 = por %p2113_p7, %p2112_p6 }
  0x2f   :  { %p2115_p9 = pnand %p2114_p8, %p2108_p5 }
  0x31   :  { %2118 = shalt.err (!%p2115_p9)
}
  0x32   :  { %50 = dma.hbm_to_vmem [thread:$0]  %s2306_s3, 16128, %s45_s18, [#allocation5], %s2148_s11, %s2148_s11, %s2149_s12  }
  0x33   :  { %s2152_s16 = smov [#allocation7]   ;;  %s2119_s21 = scalar_lea.hbm %s2308_s5, 4032 }
  0x34   :  { %s58_s17 = sshll.u32 %s2152_s16, 4  ;;  %p2120_p10 = scmp.ne.s32.totalorder %s2308_s5, %s2119_s21  ;;  %s59_s17 = int_to_ptr.vmem [resolvable:$true] %s58_s17 }
  0x35   :  { %p2123_p11 = scmp.lt.u32.totalorder %s2119_s21, %s2308_s5 }
  0x37   :  { %p2125_p12 = pnand %p2123_p11, %p2120_p10 }
  0x39   :  { %2128 = shalt.err (!%p2125_p12)
}
  0x3a   :  { %s2129_s1 = scalar_lea.vmem %s59_s17, 4032  ;;  %p2134_p0 = scmp.lt.s32.totalorder %s59_s17, %s59_s17 }
  0x3b   :  { %p2130_p13 = scmp.ne.s32.totalorder %s59_s17, %s2129_s1  ;;  %p2135_p1 = scmp.lt.s32.totalorder %s2129_s1, %s2129_s1 }
  0x3d   :  { %p2136_p2 = por %p2135_p1, %p2134_p0 }
  0x3f   :  { %p2137_p3 = pnand %p2136_p2, %p2130_p13 }
  0x41   :  { %2140 = shalt.err (!%p2137_p3)
}
  0x42   :  { %s2153_s3 = smov 64   ;;  %s2154_s11 = smov 4  }
  0x43   :  { %64 = dma.hbm_to_vmem [thread:$0]  %s2308_s5, 4032, %s59_s17, [#allocation8], %s2153_s3, %s2153_s3, %s2154_s11  }
  0x44   :  { %2141 = dma.done.wait [#allocation3], 128  }
  0x45   :  { %2142 = vsyncadd [#allocation3], 4294967168 }
  0x46   :  { %2143 = dma.done.wait [#allocation5], 16896  }
  0x47   :  { %2144 = vsyncadd [#allocation5], 4294950400 }
  0x48   :  { %2145 = dma.done.wait [#allocation8], 4032  }
  0x49   :  { %2146 = vsyncadd [#allocation8], 4294963264  ;;  %v2155_v0 = vmov 0   ;;  %vm144_vm0 = vcmask 1040384   ;;  %vm145_vm1 = vcmask 1041408   ;;  %v2156_v1 = vmov 65535  }
  0x4a   :  { %192 = vmatprep.mubr.bf16.mxu0 %v2155_v0  ;;  %233 = vmatprep.mubr.bf16.mxu1 %v2155_v0  ;;  %v146_v2 = vsel %vm144_vm0, 4294967295, %v2156_v1  ;;  %v1817_v3 = vld [vmem:[#allocation4 + $0x4] ss:$16 sps:$4 sm:$0xff]   ;;  %v1819_v4 = vld [vmem:[#allocation4] ss:$16 sps:$4 sm:$0xff]   ;;  %v80_v7 = vld [vmem:[#allocation2] sm:$0xff] }
  0x4b   :  { %v86_v5 = vld [vmem:[#allocation4 + $0x20] sm:$0x33]  ;;  %v147_v6 = vsel %vm145_vm1, %v146_v2, 0  ;;  %160 = vmatprep.subr.bf16.mxu0 %v1817_v3  ;;  %v1822_v10 = vld [vmem:[#allocation4 + $0xc] ss:$16 sps:$4 sm:$0xff]   ;;  %v81_v18 = vpack.c.bf16 %v80_v7, %v80_v7  ;;  %vm140_vm2 = vcmask 154624  }
  0x4c   :  { %v1579_v8 = vcombine.high %v86_v5, %v86_v5  ;;  %v1578_v9 = vcombine.low %v86_v5, %v86_v5  ;;  %161 = vmatpush1.bf16.msra.mxu0 %v1819_v4  ;;  %v1824_v11 = vld [vmem:[#allocation4 + $0x8] ss:$16 sps:$4 sm:$0xff]   ;;  %201 = vmatprep.subr.bf16.mxu1 %v1822_v10  ;;  %v1829_v17 = vld [vmem:[#allocation6 + $0x4] ss:$16 sps:$4 sm:$0xff]   ;;  %v1832_v21 = vld [vmem:[#allocation6 + $0xc] ss:$16 sps:$4 sm:$0xff]  }
  0x4d   :  { %v87_v12 = vld [vmem:[#allocation4 + $0x28] sm:$0x33]  ;;  %202 = vmatpush1.bf16.msra.mxu1 %v1824_v11  ;;  %v1827_v22 = vld [vmem:[#allocation6] ss:$16 sps:$4 sm:$0xff]   ;;  %v1835_v23 = vld [vmem:[#allocation6 + $0x24] ss:$16 sps:$4 sm:$0xff]  }
  0x4e   :  { %v152_v13 = vand.u32 %v1579_v8, %v147_v6  ;;  %v149_v14 = vand.u32 %v1578_v9, %v147_v6  ;;  %v1581_v15 = vcombine.high %v87_v12, %v87_v12  ;;  %v1580_v16 = vcombine.low %v87_v12, %v87_v12  ;;  %v1830_v24 = vld [vmem:[#allocation6 + $0x8] ss:$16 sps:$4 sm:$0xff]   ;;  %v1838_v25 = vld [vmem:[#allocation6 + $0x2c] ss:$16 sps:$4 sm:$0xff]   ;;  %v1833_v26 = vld [vmem:[#allocation6 + $0x20] ss:$16 sps:$4 sm:$0xff]  }
  0x4f   :  { %v1841_v27 = vld [vmem:[#allocation6 + $0x44] ss:$16 sps:$4 sm:$0xff]   ;;  %v1836_v28 = vld [vmem:[#allocation6 + $0x28] ss:$16 sps:$4 sm:$0xff]   ;;  %v1844_v29 = vld [vmem:[#allocation6 + $0x4c] ss:$16 sps:$4 sm:$0xff]  }
  0x50   :  { %162 = vmatprep.subr.bf16.mxu0 %v152_v13  ;;  %v158_v19 = vand.u32 %v1581_v15, %v147_v6  ;;  %v155_v20 = vand.u32 %v1580_v16, %v147_v6  ;;  %v1839_v30 = vld [vmem:[#allocation6 + $0x40] ss:$16 sps:$4 sm:$0xff]   ;;  %v1847_v31 = vld [vmem:[#allocation6 + $0x64] ss:$16 sps:$4 sm:$0xff]   ;;  %v1842_v32 = vld [vmem:[#allocation6 + $0x48] ss:$16 sps:$4 sm:$0xff]  }
  0x51   :  { %163 = vmatpush1.bf16.msra.mxu0 %v149_v14  ;;  %v1850_v33 = vld [vmem:[#allocation6 + $0x6c] ss:$16 sps:$4 sm:$0xff]   ;;  %v1845_v34 = vld [vmem:[#allocation6 + $0x60] ss:$16 sps:$4 sm:$0xff]   ;;  %v1853_v35 = vld [vmem:[#allocation6 + $0x84] ss:$16 sps:$4 sm:$0xff]  }
  0x52   :  { %203 = vmatprep.subr.bf16.mxu1 %v158_v19  ;;  %1044 = vmatprep.subr.bf16.mxu0 %v1829_v17  ;;  %v1848_v36 = vld [vmem:[#allocation6 + $0x68] ss:$16 sps:$4 sm:$0xff]   ;;  %v1856_v37 = vld [vmem:[#allocation6 + $0x8c] ss:$16 sps:$4 sm:$0xff]   ;;  %v1851_v38 = vld [vmem:[#allocation6 + $0x80] ss:$16 sps:$4 sm:$0xff]  }
  0x53   :  { %204 = vmatpush1.bf16.msra.mxu1 %v155_v20  ;;  %v1859_v39 = vld [vmem:[#allocation6 + $0xa4] ss:$16 sps:$4 sm:$0xff]   ;;  %v1854_v40 = vld [vmem:[#allocation6 + $0x88] ss:$16 sps:$4 sm:$0xff]   ;;  %v1862_v41 = vld [vmem:[#allocation6 + $0xac] ss:$16 sps:$4 sm:$0xff]  }
  0x54   :  { %1582 = vmatmul.mubr.msk.bf16.vlgmr.msra.gmra.mrb[0].mxu0 %vm140_vm2, %v81_v18  ;;  %1126 = vmatprep.subr.bf16.mxu1 %v1832_v21  ;;  %v1857_v42 = vld [vmem:[#allocation6 + $0xa0] ss:$16 sps:$4 sm:$0xff]   ;;  %v1865_v43 = vld [vmem:[#allocation6 + $0xc4] ss:$16 sps:$4 sm:$0xff]   ;;  %v1860_v44 = vld [vmem:[#allocation6 + $0xa8] ss:$16 sps:$4 sm:$0xff]  }
  0x55   :  { %1045 = vmatpush1.bf16.msra.mxu0 %v1827_v22  ;;  %v1868_v45 = vld [vmem:[#allocation6 + $0xcc] ss:$16 sps:$4 sm:$0xff]   ;;  %v1863_v46 = vld [vmem:[#allocation6 + $0xc0] ss:$16 sps:$4 sm:$0xff]   ;;  %v1871_v47 = vld [vmem:[#allocation6 + $0xe4] ss:$16 sps:$4 sm:$0xff]   ;;  %v90_v22 = vlaneseq }
  0x56   :  { %1583 = vmatmul.mubr.msk.bf16.vlgmr.msra.gmra.mrb[0].mxu1 %vm140_vm2, %v81_v18  ;;  %1046 = vmatprep.subr.bf16.mxu0 %v1835_v23  ;;  %v1866_v48 = vld [vmem:[#allocation6 + $0xc8] ss:$16 sps:$4 sm:$0xff]   ;;  %v1874_v49 = vld [vmem:[#allocation6 + $0xec] ss:$16 sps:$4 sm:$0xff]   ;;  %v1869_v50 = vld [vmem:[#allocation6 + $0xe0] ss:$16 sps:$4 sm:$0xff]  }
  0x57   :  { %1127 = vmatpush1.bf16.msra.mxu1 %v1830_v24  ;;  %v1877_v51 = vld [vmem:[#allocation6 + $0x104] ss:$16 sps:$4 sm:$0xff]   ;;  %v1872_v52 = vld [vmem:[#allocation6 + $0xe8] ss:$16 sps:$4 sm:$0xff]   ;;  %v1880_v53 = vld [vmem:[#allocation6 + $0x10c] ss:$16 sps:$4 sm:$0xff]  }
  0x58   :  { %1128 = vmatprep.subr.bf16.mxu1 %v1838_v25  ;;  %v1875_v54 = vld [vmem:[#allocation6 + $0x100] ss:$16 sps:$4 sm:$0xff]   ;;  %v1878_v55 = vld [vmem:[#allocation6 + $0x108] ss:$16 sps:$4 sm:$0xff]   ;;  %v1883_v56 = vld [vmem:[#allocation6 + $0x124] ss:$16 sps:$4 sm:$0xff]  }
  0x59   :  { %1047 = vmatpush1.bf16.msra.mxu0 %v1833_v26  ;;  %v1881_v57 = vld [vmem:[#allocation6 + $0x120] ss:$16 sps:$4 sm:$0xff]   ;;  %v1886_v58 = vld [vmem:[#allocation6 + $0x12c] ss:$16 sps:$4 sm:$0xff]   ;;  %v1889_v59 = vld [vmem:[#allocation6 + $0x144] ss:$16 sps:$4 sm:$0xff]  }
  0x5a   :  { %1048 = vmatprep.subr.bf16.mxu0 %v1841_v27  ;;  %v1884_v60 = vld [vmem:[#allocation6 + $0x128] ss:$16 sps:$4 sm:$0xff]   ;;  %v1892_v61 = vld [vmem:[#allocation6 + $0x14c] ss:$16 sps:$4 sm:$0xff]   ;;  %v1887_v62 = vld [vmem:[#allocation6 + $0x140] ss:$16 sps:$4 sm:$0xff]  }
  0x5b   :  { %1129 = vmatpush1.bf16.msra.mxu1 %v1836_v28  ;;  %v1895_v63 = vld [vmem:[#allocation6 + $0x164] ss:$16 sps:$4 sm:$0xff]   ;;  %v1890_v0 = vld [vmem:[#allocation6 + $0x148] ss:$16 sps:$4 sm:$0xff]   ;;  %v1898_v1 = vld [vmem:[#allocation6 + $0x16c] ss:$16 sps:$4 sm:$0xff]  }
  0x5c   :  { %1130 = vmatprep.subr.bf16.mxu1 %v1844_v29  ;;  %v1893_v2 = vld [vmem:[#allocation6 + $0x160] ss:$16 sps:$4 sm:$0xff]   ;;  %v1901_v3 = vld [vmem:[#allocation6 + $0x184] ss:$16 sps:$4 sm:$0xff]   ;;  %v1896_v4 = vld [vmem:[#allocation6 + $0x168] ss:$16 sps:$4 sm:$0xff]  }
  0x5d   :  { %1049 = vmatpush1.bf16.msra.mxu0 %v1839_v30  ;;  %v1904_v5 = vld [vmem:[#allocation6 + $0x18c] ss:$16 sps:$4 sm:$0xff]   ;;  %v1899_v6 = vld [vmem:[#allocation6 + $0x180] ss:$16 sps:$4 sm:$0xff]   ;;  %v1907_v7 = vld [vmem:[#allocation6 + $0x1a4] ss:$16 sps:$4 sm:$0xff]  }
  0x5e   :  { %1050 = vmatprep.subr.bf16.mxu0 %v1847_v31  ;;  %v1902_v8 = vld [vmem:[#allocation6 + $0x188] ss:$16 sps:$4 sm:$0xff]   ;;  %v1910_v9 = vld [vmem:[#allocation6 + $0x1ac] ss:$16 sps:$4 sm:$0xff]   ;;  %v1905_v10 = vld [vmem:[#allocation6 + $0x1a0] ss:$16 sps:$4 sm:$0xff]  }
  0x5f   :  { %1131 = vmatpush1.bf16.msra.mxu1 %v1842_v32  ;;  %v1908_v11 = vld [vmem:[#allocation6 + $0x1a8] ss:$16 sps:$4 sm:$0xff]   ;;  %v1913_v12 = vld [vmem:[#allocation6 + $0x1c4] ss:$16 sps:$4 sm:$0xff]   ;;  %v1916_v13 = vld [vmem:[#allocation6 + $0x1cc] ss:$16 sps:$4 sm:$0xff]  }
  0x60   :  { %1132 = vmatprep.subr.bf16.mxu1 %v1850_v33  ;;  %v1911_v14 = vld [vmem:[#allocation6 + $0x1c0] ss:$16 sps:$4 sm:$0xff]   ;;  %v1914_v15 = vld [vmem:[#allocation6 + $0x1c8] ss:$16 sps:$4 sm:$0xff]   ;;  %v1919_v16 = vld [vmem:[#allocation6 + $0x1e4] ss:$16 sps:$4 sm:$0xff]  }
  0x61   :  { %1051 = vmatpush1.bf16.msra.mxu0 %v1845_v34  ;;  %v1922_v17 = vld [vmem:[#allocation6 + $0x1ec] ss:$16 sps:$4 sm:$0xff]   ;;  %v1917_v18 = vld [vmem:[#allocation6 + $0x1e0] ss:$16 sps:$4 sm:$0xff]   ;;  %v1920_v19 = vld [vmem:[#allocation6 + $0x1e8] ss:$16 sps:$4 sm:$0xff]  }
  0x62   :  { %1052 = vmatprep.subr.bf16.mxu0 %v1853_v35  ;;  %v1925_v20 = vld [vmem:[#allocation6 + $0x204] ss:$16 sps:$4 sm:$0xff]   ;;  %v1928_v21 = vld [vmem:[#allocation6 + $0x20c] ss:$16 sps:$4 sm:$0xff]   ;;  %v2252_v23 = vshrl.u32 %v90_v22, 7  ;;  %vm1028_vm3 = vcmask 949248  }
  0x63   :  { %1133 = vmatpush1.bf16.msra.mxu1 %v1848_v36  ;;  %v2258_v25 = vld [vmem:[%s2305_s2] sm:$0xf]  ;;  %v1985_v22 = vld [vmem:[#allocation6 + $0x344] ss:$16 sps:$4 sm:$0xff]  }
  0x64   :  { %1134 = vmatprep.subr.bf16.mxu1 %v1856_v37  ;;  %v92_v24 = vsub.s32 0, %v2252_v23  ;;  %v96_v26 = vsub.s32 1, %v2252_v23  ;;  %v104_v27 = vsub.s32 3, %v2252_v23 }
  0x65   :  { %1053 = vmatpush1.bf16.msra.mxu0 %v1851_v38 }
  0x66   :  { %1054 = vmatprep.subr.bf16.mxu0 %v1859_v39  ;;  %v93_v28 = vrot.slane %v2258_v25, %v92_v24  ;;  %v97_v29 = vrot.slane %v2258_v25, %v96_v26  ;;  %v105_v31 = vrot.slane %v2258_v25, %v104_v27 }
  0x67   :  { %1135 = vmatpush1.bf16.msra.mxu1 %v1854_v40 }
  0x68   :  { %1136 = vmatprep.subr.bf16.mxu1 %v1862_v41 }
  0x69   :  { %1055 = vmatpush1.bf16.msra.mxu0 %v1857_v42 }
  0x6a   :  { %1056 = vmatprep.subr.bf16.mxu0 %v1865_v43 }
  0x6b   :  { %1137 = vmatpush1.bf16.msra.mxu1 %v1860_v44 }
  0x6c   :  { %1138 = vmatprep.subr.bf16.mxu1 %v1868_v45  ;;  %v1923_v45 = vld [vmem:[#allocation6 + $0x200] ss:$16 sps:$4 sm:$0xff]  }
  0x6d   :  { %1057 = vmatpush1.bf16.msra.mxu0 %v1863_v46  ;;  %v1926_v46 = vld [vmem:[#allocation6 + $0x208] ss:$16 sps:$4 sm:$0xff]  }
  0x6e   :  { %1058 = vmatprep.subr.bf16.mxu0 %v1871_v47 }
  0x6f   :  { %1139 = vmatpush1.bf16.msra.mxu1 %v1866_v48 }
  0x70   :  { %1140 = vmatprep.subr.bf16.mxu1 %v1874_v49  ;;  %v1931_v49 = vld [vmem:[#allocation6 + $0x224] ss:$16 sps:$4 sm:$0xff]  }
  0x71   :  { %1059 = vmatpush1.bf16.msra.mxu0 %v1869_v50  ;;  %v1934_v50 = vld [vmem:[#allocation6 + $0x22c] ss:$16 sps:$4 sm:$0xff]  }
  0x72   :  { %1060 = vmatprep.subr.bf16.mxu0 %v1877_v51 }
  0x73   :  { %1141 = vmatpush1.bf16.msra.mxu1 %v1872_v52  ;;  %v1929_v52 = vld [vmem:[#allocation6 + $0x220] ss:$16 sps:$4 sm:$0xff]  }
  0x74   :  { %1142 = vmatprep.subr.bf16.mxu1 %v1880_v53  ;;  %v1932_v53 = vld [vmem:[#allocation6 + $0x228] ss:$16 sps:$4 sm:$0xff]  }
  0x75   :  { %1061 = vmatpush1.bf16.msra.mxu0 %v1875_v54  ;;  %v1937_v54 = vld [vmem:[#allocation6 + $0x244] ss:$16 sps:$4 sm:$0xff]  }
  0x76   :  { %1062 = vmatprep.subr.bf16.mxu0 %v1883_v56  ;;  %v1935_v56 = vld [vmem:[#allocation6 + $0x240] ss:$16 sps:$4 sm:$0xff]  }
  0x77   :  { %1143 = vmatpush1.bf16.msra.mxu1 %v1878_v55  ;;  %v1940_v55 = vld [vmem:[#allocation6 + $0x24c] ss:$16 sps:$4 sm:$0xff]  }
  0x78   :  { %1144 = vmatprep.subr.bf16.mxu1 %v1886_v58  ;;  %v1943_v58 = vld [vmem:[#allocation6 + $0x264] ss:$16 sps:$4 sm:$0xff]  }
  0x79   :  { %1063 = vmatpush1.bf16.msra.mxu0 %v1881_v57  ;;  %v1938_v57 = vld [vmem:[#allocation6 + $0x248] ss:$16 sps:$4 sm:$0xff]  }
  0x7a   :  { %1064 = vmatprep.subr.bf16.mxu0 %v1889_v59  ;;  %v1946_v59 = vld [vmem:[#allocation6 + $0x26c] ss:$16 sps:$4 sm:$0xff]  }
  0x7b   :  { %1145 = vmatpush1.bf16.msra.mxu1 %v1884_v60  ;;  %v1941_v60 = vld [vmem:[#allocation6 + $0x260] ss:$16 sps:$4 sm:$0xff]  }
  0x7c   :  { %1146 = vmatprep.subr.bf16.mxu1 %v1892_v61  ;;  %v1944_v61 = vld [vmem:[#allocation6 + $0x268] ss:$16 sps:$4 sm:$0xff]  }
  0x7d   :  { %1065 = vmatpush1.bf16.msra.mxu0 %v1887_v62  ;;  %v1949_v62 = vld [vmem:[#allocation6 + $0x284] ss:$16 sps:$4 sm:$0xff]  }
  0x7e   :  { %1066 = vmatprep.subr.bf16.mxu0 %v1895_v63  ;;  %v1952_v63 = vld [vmem:[#allocation6 + $0x28c] ss:$16 sps:$4 sm:$0xff]  }
  0x7f   :  { %1147 = vmatpush1.bf16.msra.mxu1 %v1890_v0  ;;  %v1947_v0 = vld [vmem:[#allocation6 + $0x280] ss:$16 sps:$4 sm:$0xff]  }
  0x80   :  { %1148 = vmatprep.subr.bf16.mxu1 %v1898_v1  ;;  %v1950_v1 = vld [vmem:[#allocation6 + $0x288] ss:$16 sps:$4 sm:$0xff]  }
  0x81   :  { %1067 = vmatpush1.bf16.msra.mxu0 %v1893_v2  ;;  %v1955_v2 = vld [vmem:[#allocation6 + $0x2a4] ss:$16 sps:$4 sm:$0xff]  }
  0x82   :  { %1068 = vmatprep.subr.bf16.mxu0 %v1901_v3  ;;  %v1958_v3 = vld [vmem:[#allocation6 + $0x2ac] ss:$16 sps:$4 sm:$0xff]  }
  0x83   :  { %1149 = vmatpush1.bf16.msra.mxu1 %v1896_v4  ;;  %v1953_v4 = vld [vmem:[#allocation6 + $0x2a0] ss:$16 sps:$4 sm:$0xff]  }
  0x84   :  { %1150 = vmatprep.subr.bf16.mxu1 %v1904_v5  ;;  %v1956_v5 = vld [vmem:[#allocation6 + $0x2a8] ss:$16 sps:$4 sm:$0xff]  }
  0x85   :  { %1069 = vmatpush1.bf16.msra.mxu0 %v1899_v6  ;;  %v1961_v6 = vld [vmem:[#allocation6 + $0x2c4] ss:$16 sps:$4 sm:$0xff]  }
  0x86   :  { %1070 = vmatprep.subr.bf16.mxu0 %v1907_v7  ;;  %v1964_v7 = vld [vmem:[#allocation6 + $0x2cc] ss:$16 sps:$4 sm:$0xff]  }
  0x87   :  { %1151 = vmatpush1.bf16.msra.mxu1 %v1902_v8  ;;  %v1959_v8 = vld [vmem:[#allocation6 + $0x2c0] ss:$16 sps:$4 sm:$0xff]  }
  0x88   :  { %1152 = vmatprep.subr.bf16.mxu1 %v1910_v9  ;;  %v1962_v9 = vld [vmem:[#allocation6 + $0x2c8] ss:$16 sps:$4 sm:$0xff]  }
  0x89   :  { %1071 = vmatpush1.bf16.msra.mxu0 %v1905_v10  ;;  %v1967_v10 = vld [vmem:[#allocation6 + $0x2e4] ss:$16 sps:$4 sm:$0xff]  }
  0x8a   :  { %1072 = vmatprep.subr.bf16.mxu0 %v1913_v12  ;;  %v1965_v12 = vld [vmem:[#allocation6 + $0x2e0] ss:$16 sps:$4 sm:$0xff]  }
  0x8b   :  { %1153 = vmatpush1.bf16.msra.mxu1 %v1908_v11  ;;  %v1970_v11 = vld [vmem:[#allocation6 + $0x2ec] ss:$16 sps:$4 sm:$0xff]  }
  0x8c   :  { %1154 = vmatprep.subr.bf16.mxu1 %v1916_v13  ;;  %v1968_v13 = vld [vmem:[#allocation6 + $0x2e8] ss:$16 sps:$4 sm:$0xff]  }
  0x8d   :  { %1073 = vmatpush1.bf16.msra.mxu0 %v1911_v14  ;;  %v1973_v14 = vld [vmem:[#allocation6 + $0x304] ss:$16 sps:$4 sm:$0xff]  }
  0x8e   :  { %1074 = vmatprep.subr.bf16.mxu0 %v1919_v16  ;;  %v1971_v16 = vld [vmem:[#allocation6 + $0x300] ss:$16 sps:$4 sm:$0xff]  }
  0x8f   :  { %1155 = vmatpush1.bf16.msra.mxu1 %v1914_v15  ;;  %v1976_v15 = vld [vmem:[#allocation6 + $0x30c] ss:$16 sps:$4 sm:$0xff]  }
  0x90   :  { %1156 = vmatprep.subr.bf16.mxu1 %v1922_v17  ;;  %v1974_v17 = vld [vmem:[#allocation6 + $0x308] ss:$16 sps:$4 sm:$0xff]  }
  0x91   :  { %1075 = vmatpush1.bf16.msra.mxu0 %v1917_v18  ;;  %v1979_v18 = vld [vmem:[#allocation6 + $0x324] ss:$16 sps:$4 sm:$0xff]  }
  0x92   :  { %1085 = vmatprep.subr.bf16.mxu0 %v1925_v20  ;;  %v1977_v20 = vld [vmem:[#allocation6 + $0x320] ss:$16 sps:$4 sm:$0xff]  }
  0x93   :  { %1157 = vmatpush1.bf16.msra.mxu1 %v1920_v19  ;;  %v1982_v19 = vld [vmem:[#allocation6 + $0x32c] ss:$16 sps:$4 sm:$0xff]  }
  0x94   :  { %1167 = vmatprep.subr.bf16.mxu1 %v1928_v21  ;;  %v1980_v21 = vld [vmem:[#allocation6 + $0x328] ss:$16 sps:$4 sm:$0xff]  }
 0x127   :  { %v194_v30 = vpop.f32.mrb[0].mxu0 }
 0x128   :  { %v195_v32 = vadd.f32 %v194_v30, %v93_v28  ;;  %v196_v33 = vpop.f32.mrb[1].mxu0  ;;  %v1988_v28 = vld [vmem:[#allocation6 + $0x34c] ss:$16 sps:$4 sm:$0xff]   ;;  %v1986_v30 = vld [vmem:[#allocation6 + $0x348] ss:$16 sps:$4 sm:$0xff]  }
 0x129   :  { %v197_v34 = vadd.f32 %v196_v33, %v97_v29  ;;  %v198_v35 = vpop.f32.mrb[2].mxu0  ;;  %v2271_v36 = vpop.f32.mrb[0].mxu1  ;;  %v1983_v29 = vld [vmem:[#allocation6 + $0x340] ss:$16 sps:$4 sm:$0xff]  }
 0x12a   :  { %v242_v37 = vmax.f32 %v195_v32, 0.0  ;;  %v199_v38 = vpop.f32.mrb[3].mxu0  ;;  %v237_v39 = vpop.f32.mrb[1].mxu1  ;;  %v1994_v32 = vld [vmem:[#allocation6 + $0x36c] ss:$16 sps:$4 sm:$0xff]  }
 0x12b   :  { %v243_v40 = vmax.f32 %v197_v34, 0.0  ;;  %v238_v41 = vadd.f32 %v237_v39, %v105_v31  ;;  %v239_v42 = vpop.f32.mrb[2].mxu1  ;;  %v1991_v31 = vld [vmem:[#allocation6 + $0x364] ss:$16 sps:$4 sm:$0xff]   ;;  %v1989_v33 = vld [vmem:[#allocation6 + $0x360] ss:$16 sps:$4 sm:$0xff]  }
 0x12c   :  { %v240_v43 = vpop.f32.mrb[3].mxu1  ;;  %v246_v48 = vpack.c.bf16 %v242_v37, %v242_v37  ;;  %v1992_v34 = vld [vmem:[#allocation6 + $0x368] ss:$16 sps:$4 sm:$0xff]   ;;  %v1997_v35 = vld [vmem:[#allocation6 + $0x384] ss:$16 sps:$4 sm:$0xff]  }
 0x12d   :  { %v247_v44 = vpack.c.bf16 %v243_v40, %v243_v40  ;;  %v245_v47 = vmax.f32 %v238_v41, 0.0  ;;  %v2000_v37 = vld [vmem:[#allocation6 + $0x38c] ss:$16 sps:$4 sm:$0xff]   ;;  %v1995_v38 = vld [vmem:[#allocation6 + $0x380] ss:$16 sps:$4 sm:$0xff]   ;;  %v100_v40 = vsub.s32 2, %v2252_v23 }
 0x12e   :  { %v1998_v39 = vld [vmem:[#allocation6 + $0x388] ss:$16 sps:$4 sm:$0xff]   ;;  %v2003_v41 = vld [vmem:[#allocation6 + $0x3a4] ss:$16 sps:$4 sm:$0xff]   ;;  %v2006_v42 = vld [vmem:[#allocation6 + $0x3ac] ss:$16 sps:$4 sm:$0xff]  }
 0x12f   :  { %1076 = vmatprep.mubr.bf16.mxu0 %v247_v44  ;;  %1158 = vmatprep.mubr.bf16.mxu1 %v247_v44  ;;  %v249_v51 = vpack.c.bf16 %v245_v47, %v245_v47  ;;  %v2001_v43 = vld [vmem:[#allocation6 + $0x3a0] ss:$16 sps:$4 sm:$0xff]   ;;  %v2004_v44 = vld [vmem:[#allocation6 + $0x3a8] ss:$16 sps:$4 sm:$0xff]   ;;  %v2012_v47 = vld [vmem:[#allocation6 + $0x3cc] ss:$16 sps:$4 sm:$0xff]  }
 0x130   :  { %1077 = vmatmul.mubr.bf16.vlgmr.msra.gmra.mrb[4].mxu0 %v246_v48  ;;  %1159 = vmatmul.mubr.bf16.vlgmr.msra.gmra.mrb[4].mxu1 %v246_v48  ;;  %v374_v48 = vld [vmem:[#allocation6 + $0x3e0] sm:$0x33] }
 0x131   :  { %1086 = vmatpush1.bf16.msra.mxu0 %v1923_v45  ;;  %1168 = vmatpush1.bf16.msra.mxu1 %v1926_v46  ;;  %v2009_v45 = vld [vmem:[#allocation6 + $0x3c4] ss:$16 sps:$4 sm:$0xff]   ;;  %v101_v46 = vrot.slane %v2258_v25, %v100_v40 }
 0x132   :  { %1087 = vmatprep.subr.bf16.mxu0 %v1931_v49  ;;  %1169 = vmatprep.subr.bf16.mxu1 %v1934_v50  ;;  %v375_v49 = vld [vmem:[#allocation6 + $0x3e8] sm:$0x33]  ;;  %v2007_v50 = vld [vmem:[#allocation6 + $0x3c0] ss:$16 sps:$4 sm:$0xff]  }
 0x133   :  { %1713 = vmatprep.mubr.msk.bf16.mxu0 %vm1028_vm3, %v249_v51  ;;  %1715 = vmatprep.mubr.msk.bf16.mxu1 %vm1028_vm3, %v249_v51  ;;  %v2010_v51 = vld [vmem:[#allocation6 + $0x3c8] ss:$16 sps:$4 sm:$0xff]  }
 0x135   :  { %1088 = vmatpush1.bf16.msra.mxu0 %v1929_v52  ;;  %1170 = vmatpush1.bf16.msra.mxu1 %v1932_v53  ;;  %v1709_v52 = vcombine.high %v374_v48, %v374_v48  ;;  %v1711_v53 = vcombine.high %v375_v49, %v375_v49 }
 0x136   :  { %1089 = vmatprep.subr.bf16.mxu0 %v1937_v54  ;;  %1171 = vmatprep.subr.bf16.mxu1 %v1940_v55  ;;  %v236_v54 = vadd.f32 %v2271_v36, %v101_v46  ;;  %v1708_v55 = vcombine.low %v374_v48, %v374_v48  ;;  %v2019_v36 = vld [vmem:[#allocation7] sm:$0xff]  }
 0x138   :  { %v244_v25 = vmax.f32 %v236_v54, 0.0 }
 0x139   :  { %1090 = vmatpush1.bf16.msra.mxu0 %v1935_v56  ;;  %1172 = vmatpush1.bf16.msra.mxu1 %v1938_v57  ;;  %v1710_v56 = vcombine.low %v375_v49, %v375_v49  ;;  %v1033_v57 = vsel %vm145_vm1, %v1708_v55, 0 }
 0x13a   :  { %1091 = vmatprep.subr.bf16.mxu0 %v1943_v58  ;;  %1173 = vmatprep.subr.bf16.mxu1 %v1946_v59  ;;  %v2017_v59 = vld [vmem:[#allocation7 + $0x40] sm:$0xff]  }
 0x13b   :  { %v1039_v58 = vsel %vm145_vm1, %v1710_v56, 0  ;;  %v1716_v56 = vld [vmem:[%s2309_s6] ss:$0 sm:$0xff] }
 0x13d   :  { %1092 = vmatpush1.bf16.msra.mxu0 %v1941_v60  ;;  %1174 = vmatpush1.bf16.msra.mxu1 %v1944_v61  ;;  %v2018_v60 = vld [vmem:[#allocation7 + $0xc0] sm:$0xff]  }
 0x13e   :  { %1093 = vmatprep.subr.bf16.mxu0 %v1949_v62  ;;  %1175 = vmatprep.subr.bf16.mxu1 %v1952_v63  ;;  %v2020_v61 = vld [vmem:[#allocation7 + $0x80] sm:$0xff]   ;;  %v248_v62 = vpack.c.bf16 %v244_v25, %v244_v25  ;;  %v2021_v63 = vld [vmem:[#allocation7 + $0x48] sm:$0xff]  }
 0x141   :  { %1094 = vmatpush1.bf16.msra.mxu0 %v1947_v0  ;;  %1176 = vmatpush1.bf16.msra.mxu1 %v1950_v1  ;;  %v2022_v0 = vld [vmem:[#allocation7 + $0xc8] sm:$0xff]  }
 0x142   :  { %1095 = vmatprep.subr.bf16.mxu0 %v1955_v2  ;;  %1177 = vmatprep.subr.bf16.mxu1 %v1958_v3  ;;  %v2023_v1 = vld [vmem:[#allocation7 + $0x8] sm:$0xff]   ;;  %v2025_v3 = vld [vmem:[#allocation7 + $0x50] sm:$0xff]  }
 0x143   :  { %v2024_v2 = vld [vmem:[#allocation7 + $0x88] sm:$0xff]  }
 0x145   :  { %1096 = vmatpush1.bf16.msra.mxu0 %v1953_v4  ;;  %1178 = vmatpush1.bf16.msra.mxu1 %v1956_v5  ;;  %v2026_v4 = vld [vmem:[#allocation7 + $0xd0] sm:$0xff]  }
 0x146   :  { %1097 = vmatprep.subr.bf16.mxu0 %v1961_v6  ;;  %1179 = vmatprep.subr.bf16.mxu1 %v1964_v7  ;;  %v2027_v5 = vld [vmem:[#allocation7 + $0x10] sm:$0xff]   ;;  %v2029_v7 = vld [vmem:[#allocation7 + $0x58] sm:$0xff]  }
 0x147   :  { %v2028_v6 = vld [vmem:[#allocation7 + $0x90] sm:$0xff]  }
 0x149   :  { %1098 = vmatpush1.bf16.msra.mxu0 %v1959_v8  ;;  %1180 = vmatpush1.bf16.msra.mxu1 %v1962_v9  ;;  %v2030_v8 = vld [vmem:[#allocation7 + $0xd8] sm:$0xff]  }
 0x14a   :  { %1099 = vmatprep.subr.bf16.mxu0 %v1967_v10  ;;  %1181 = vmatprep.subr.bf16.mxu1 %v1970_v11  ;;  %v2031_v9 = vld [vmem:[#allocation7 + $0x18] sm:$0xff]   ;;  %v2033_v11 = vld [vmem:[#allocation7 + $0x60] sm:$0xff]  }
 0x14b   :  { %v2032_v10 = vld [vmem:[#allocation7 + $0x98] sm:$0xff]  }
 0x14d   :  { %1100 = vmatpush1.bf16.msra.mxu0 %v1965_v12  ;;  %1182 = vmatpush1.bf16.msra.mxu1 %v1968_v13  ;;  %v2034_v12 = vld [vmem:[#allocation7 + $0xe0] sm:$0xff]  }
 0x14e   :  { %1101 = vmatprep.subr.bf16.mxu0 %v1973_v14  ;;  %1183 = vmatprep.subr.bf16.mxu1 %v1976_v15  ;;  %v2035_v13 = vld [vmem:[#allocation7 + $0x20] sm:$0xff]   ;;  %v2037_v15 = vld [vmem:[#allocation7 + $0x68] sm:$0xff]  }
 0x14f   :  { %v2036_v14 = vld [vmem:[#allocation7 + $0xa0] sm:$0xff]  }
 0x151   :  { %1102 = vmatpush1.bf16.msra.mxu0 %v1971_v16  ;;  %1184 = vmatpush1.bf16.msra.mxu1 %v1974_v17  ;;  %v2038_v16 = vld [vmem:[#allocation7 + $0xe8] sm:$0xff]  }
 0x152   :  { %1103 = vmatprep.subr.bf16.mxu0 %v1979_v18  ;;  %1185 = vmatprep.subr.bf16.mxu1 %v1982_v19  ;;  %v2039_v17 = vld [vmem:[#allocation7 + $0x28] sm:$0xff]   ;;  %v2041_v19 = vld [vmem:[#allocation7 + $0x70] sm:$0xff]  }
 0x153   :  { %v2040_v18 = vld [vmem:[#allocation7 + $0xa8] sm:$0xff]  }
 0x155   :  { %1104 = vmatpush1.bf16.msra.mxu0 %v1977_v20  ;;  %1186 = vmatpush1.bf16.msra.mxu1 %v1980_v21  ;;  %v2042_v20 = vld [vmem:[#allocation7 + $0xf0] sm:$0xff]  }
 0x156   :  { %1105 = vmatprep.subr.bf16.mxu0 %v1985_v22  ;;  %1187 = vmatprep.subr.bf16.mxu1 %v1988_v28  ;;  %v2043_v21 = vld [vmem:[#allocation7 + $0x30] sm:$0xff]   ;;  %v2045_v28 = vld [vmem:[#allocation7 + $0x78] sm:$0xff]  }
 0x157   :  { %v2044_v22 = vld [vmem:[#allocation7 + $0xb0] sm:$0xff]  }
 0x159   :  { %1106 = vmatpush1.bf16.msra.mxu0 %v1983_v29  ;;  %1188 = vmatpush1.bf16.msra.mxu1 %v1986_v30  ;;  %v2046_v29 = vld [vmem:[#allocation7 + $0xf8] ss:$0 sps:$4 sm:$0x33]  }
 0x15a   :  { %1107 = vmatprep.subr.bf16.mxu0 %v1991_v31  ;;  %1189 = vmatprep.subr.bf16.mxu1 %v1994_v32  ;;  %v2047_v30 = vld [vmem:[#allocation7 + $0x38] sm:$0xff]  }
 0x15b   :  { %v2048_v31 = vld [vmem:[#allocation7 + $0xb8] sm:$0xff]  }
 0x15c   :  { %v376_v32 = vld [vmem:[%s2307_s4] sm:$0xf] }
 0x15d   :  { %1108 = vmatpush1.bf16.msra.mxu0 %v1989_v33  ;;  %1190 = vmatpush1.bf16.msra.mxu1 %v1992_v34  ;;  %v381_v33 = vrot.slane %v376_v32, %v92_v24  ;;  %v389_v34 = vrot.slane %v376_v32, %v100_v40 }
 0x15e   :  { %1109 = vmatprep.subr.bf16.mxu0 %v1997_v35  ;;  %1191 = vmatprep.subr.bf16.mxu1 %v2000_v37  ;;  %v385_v35 = vrot.slane %v376_v32, %v96_v26  ;;  %v393_v37 = vrot.slane %v376_v32, %v104_v27 }
 0x161   :  { %1110 = vmatpush1.bf16.msra.mxu0 %v1995_v38  ;;  %1192 = vmatpush1.bf16.msra.mxu1 %v1998_v39 }
 0x162   :  { %1111 = vmatprep.subr.bf16.mxu0 %v2003_v41  ;;  %1193 = vmatprep.subr.bf16.mxu1 %v2006_v42 }
 0x165   :  { %1112 = vmatpush1.bf16.msra.mxu0 %v2001_v43  ;;  %1194 = vmatpush1.bf16.msra.mxu1 %v2004_v44 }
 0x166   :  { %1113 = vmatprep.subr.bf16.mxu0 %v2009_v45  ;;  %1195 = vmatprep.subr.bf16.mxu1 %v2012_v47 }
 0x169   :  { %1114 = vmatpush1.bf16.msra.mxu0 %v2007_v50  ;;  %1196 = vmatpush1.bf16.msra.mxu1 %v2010_v51 }
 0x16a   :  { %1712 = vmatprep.subr.msk.bf16.mxu0 %vm145_vm1, %v1709_v52  ;;  %1714 = vmatprep.subr.msk.bf16.mxu1 %vm145_vm1, %v1711_v53 }
 0x16d   :  { %1116 = vmatpush1.bf16.msra.mxu0 %v1033_v57  ;;  %1198 = vmatpush1.bf16.msra.mxu1 %v1039_v58 }
 0x16e   :  { %1750 = vmatprep.subr.bf16.mxu0 %v2017_v59  ;;  %1772 = vmatprep.subr.bf16.mxu1 %v2018_v60 }
 0x170   :  { %1118 = vmatmul.mubr.bf16.vlgmr.msra.gmra.mrb[4].mxu0 %v248_v62  ;;  %1200 = vmatmul.mubr.bf16.vlgmr.msra.gmra.mrb[4].mxu1 %v248_v62 }
 0x171   :  { %1751 = vmatpush3.bf16.msra.mxu0 %v2019_v36  ;;  %1773 = vmatpush3.bf16.msra.mxu1 %v2020_v61 }
 0x172   :  { %1752 = vmatprep.subr.bf16.mxu0 %v2021_v63  ;;  %1774 = vmatprep.subr.bf16.mxu1 %v2022_v0 }
 0x175   :  { %1753 = vmatpush3.bf16.msra.mxu0 %v2023_v1  ;;  %1775 = vmatpush3.bf16.msra.mxu1 %v2024_v2 }
 0x176   :  { %1754 = vmatprep.subr.bf16.mxu0 %v2025_v3  ;;  %1776 = vmatprep.subr.bf16.mxu1 %v2026_v4 }
 0x179   :  { %1755 = vmatpush3.bf16.msra.mxu0 %v2027_v5  ;;  %1777 = vmatpush3.bf16.msra.mxu1 %v2028_v6 }
 0x17a   :  { %1756 = vmatprep.subr.bf16.mxu0 %v2029_v7  ;;  %1778 = vmatprep.subr.bf16.mxu1 %v2030_v8 }
 0x17d   :  { %1757 = vmatpush3.bf16.msra.mxu0 %v2031_v9  ;;  %1779 = vmatpush3.bf16.msra.mxu1 %v2032_v10 }
 0x17e   :  { %1758 = vmatprep.subr.bf16.mxu0 %v2033_v11  ;;  %1780 = vmatprep.subr.bf16.mxu1 %v2034_v12 }
 0x181   :  { %1759 = vmatpush3.bf16.msra.mxu0 %v2035_v13  ;;  %1781 = vmatpush3.bf16.msra.mxu1 %v2036_v14 }
 0x182   :  { %1760 = vmatprep.subr.bf16.mxu0 %v2037_v15  ;;  %1782 = vmatprep.subr.bf16.mxu1 %v2038_v16 }
 0x185   :  { %1761 = vmatpush3.bf16.msra.mxu0 %v2039_v17  ;;  %1783 = vmatpush3.bf16.msra.mxu1 %v2040_v18 }
 0x186   :  { %1762 = vmatprep.subr.bf16.mxu0 %v2041_v19  ;;  %1784 = vmatprep.subr.bf16.mxu1 %v2042_v20 }
 0x189   :  { %1763 = vmatpush3.bf16.msra.mxu0 %v2043_v21  ;;  %1785 = vmatpush3.bf16.msra.mxu1 %v2044_v22 }
 0x18a   :  { %1764 = vmatprep.subr.bf16.mxu0 %v2045_v28  ;;  %1806 = vmatprep.subr.msk.bf16.mxu1 %vm145_vm1, %v2046_v29 }
 0x18d   :  { %1765 = vmatpush3.bf16.msra.mxu0 %v2047_v30  ;;  %1787 = vmatpush3.bf16.msra.mxu1 %v2048_v31 }
 0x243   :  { %v1119_v38 = vpop.f32.mrb[4].mxu0  ;;  %v1201_v39 = vpop.f32.mrb[4].mxu1 }
 0x244   :  { %v1794_v41 = vadd.f32 %v1119_v38, %v381_v33  ;;  %v1796_v42 = vadd.f32 %v1201_v39, %v389_v34  ;;  %v1121_v43 = vpop.f32.mrb[5].mxu0  ;;  %v1203_v44 = vpop.f32.mrb[5].mxu1 }
 0x245   :  { %v1795_v45 = vadd.f32 %v1121_v43, %v385_v35  ;;  %v1797_v46 = vadd.f32 %v1203_v44, %v393_v37  ;;  %v1123_v47 = vpop.f32.mrb[6].mxu0  ;;  %v1205_v48 = vpop.f32.mrb[6].mxu1 }
 0x246   :  { %v1208_v24 = vmax.f32 %v1794_v41, 0.0  ;;  %v1210_v49 = vmax.f32 %v1796_v42, 0.0  ;;  %v1124_v50 = vpop.f32.mrb[7].mxu0  ;;  %v1206_v40 = vpop.f32.mrb[7].mxu1 }
 0x247   :  { %v1209_v51 = vmax.f32 %v1795_v45, 0.0  ;;  %v1211_v52 = vmax.f32 %v1797_v46, 0.0 }
 0x248   :  { %v1212_v23 = vpack.c.bf16 %v1208_v24, %v1208_v24  ;;  %v1214_v27 = vpack.c.bf16 %v1210_v49, %v1210_v49 }
 0x249   :  { %v1213_v26 = vpack.c.bf16 %v1209_v51, %v1209_v51  ;;  %v1215_v53 = vpack.c.bf16 %v1211_v52, %v1211_v52 }
 0x24b   :  { %1513 = vmatprep.mubr.bf16.mxu0 %v1213_v26  ;;  %1749 = vmatprep.mubr.msk.bf16.mxu1 %vm1028_vm3, %v1215_v53 }
 0x24c   :  { %1514 = vmatmul.mubr.bf16.vlgmr.msra.gmra.mrb[8].mxu0 %v1212_v23  ;;  %1554 = vmatmul.mubr.bf16.vlgmr.msra.gmra.mrb[8].mxu1 %v1214_v27 }
 0x31f   :  { %v1766_v54 = vpop.f32.mrb[8].mxu0  ;;  %v1788_v55 = vpop.f32.mrb[8].mxu1 }
 0x320   :  { %v1767_v25 = vpop.f32.mrb[9].mxu0  ;;  %v1789_v57 = vpop.f32.mrb[9].mxu1 }
 0x321   :  { %v1768_v58 = vadd.f32 %v1767_v25, %v1766_v54  ;;  %v1790_v59 = vadd.f32 %v1789_v57, %v1788_v55  ;;  %v1769_v60 = vpop.f32.mrb[10].mxu0  ;;  %v1791_v36 = vpop.f32.mrb[10].mxu1 }
 0x322   :  { %v1770_v61 = vpop.f32.mrb[11].mxu0  ;;  %v1792_v62 = vpop.f32.mrb[11].mxu1 }
 0x323   :  { %v1516_v63 = vadd.f32 %v1768_v58, %v1716_v56 }
 0x325   :  { %v1556_v0 = vadd.f32 %v1790_v59, %v1516_v63 }
 0x327   :  { %v1561_v1 = vsub.f32 0.0, %v1556_v0 }
 0x329   :  { %v1562_v2 = vmul.f32 1.442695, %v1561_v1 }
 0x32b   :  { %2049 = vpow2.f32 %v1562_v2 }
 0x335   :  { %v2050_v3 = vpop.eup %2049 }
 0x336   :  { %v1564_v4 = vadd.f32 1.0, %v2050_v3 }
 0x338   :  { %2051 = vrcp.f32 %v1564_v4 }
 0x342   :  { %v2052_v5 = vpop.eup %2051 }
 0x343   :  { %1566 = vst [vmem:[%s2310_s7] sm:$0xff] %v2052_v5 }
 0x344   :  { %1571 = vsyncpa [#allocation3], 1 }
 0x345   :  { %1572 = vsyncpa [#allocation5], 1 }
 0x346   :  { %1573 = vsyncpa [#allocation8], 1 }

</bundles_post_ra>
